<compile_context>
chip_gen: v7x
topology: tpu7x:2x2x1
jax: 0.10.0
libtpu: 0.0.40
codegen_flags: <defaults>
</compile_context>

<pallas_src>
import functools

import jax
import jax.numpy as jnp
from jax import lax
from jax.experimental import pallas as pl
from jax.experimental.pallas import tpu as pltpu


def _conv_stats_kernel(patch_ref, w_ref, y_ref, psum_ref, psumsq_ref):
    # patch_ref : (B, K*K*Cin, M)   im2col'd raw (un-ReLU'd) input, lane-dense
    # w_ref     : (Cout, K*K*Cin)   fused depthwise*pointwise weight
    # y_ref     : (B, Cout, M)      staged un-normalized conv output
    # psum_ref  : (1, Cout, 1)      per-step partial sum   (for BN batch stats)
    # psumsq_ref: (1, Cout, 1)      per-step partial sumsq
    B = patch_ref.shape[0]
    Cout = w_ref.shape[0]
    w = w_ref[...]
    acc_s = jnp.zeros((Cout, 1), jnp.float32)
    acc_q = jnp.zeros((Cout, 1), jnp.float32)
    for b in range(B):                                     # static unroll, B small
        p = jnp.maximum(patch_ref[b], 0.0)                 # ReLU (commutes with im2col)
        y = jnp.dot(w, p, preferred_element_type=jnp.float32)   # (Cout, M) on MXU
        y_ref[b] = y.astype(y_ref.dtype)                   # dense, unmasked vst (M mult of 128)
        acc_s = acc_s + jnp.sum(y, axis=1, keepdims=True)
        acc_q = acc_q + jnp.sum(y * y, axis=1, keepdims=True)
    psum_ref[0] = acc_s
    psumsq_ref[0] = acc_q


def _bn_apply_kernel(y_ref, scale_ref, shift_ref, out_ref):
    # y_ref: (B, Cout, M); scale/shift: (Cout, 1); out aliases y's HBM buffer.
    out_ref[...] = (y_ref[...] * scale_ref[...] + shift_ref[...]).astype(out_ref.dtype)


def dilconv_forward(x, wd, wp, gamma, beta, *,
                    stride=1, padding=0, dilation=1, eps=1e-5, batch_block=8):
    """x: (N, Cin, H, W); wd: (Cin, 1, K, K); wp: (Cout, Cin, 1, 1)."""
    N, Cin, H, W = x.shape
    Cout = wp.shape[0]
    K = wd.shape[-1]
    HO = (H + 2 * padding - dilation * (K - 1) - 1) // stride + 1
    WO = (W + 2 * padding - dilation * (K - 1) - 1) // stride + 1
    M = HO * WO
    KKC = K * K * Cin

    # ---- wrapper-side im2col: lane-dense (KKC, M) per image, stride/dilation
    #      folded into XLA slicing (no in-kernel strided loads / relayout) ----
    xpad = jnp.pad(x.astype(jnp.float32),
                   ((0, 0), (0, 0), (padding, padding), (padding, padding)))
    taps = []
    for i in range(K):
        for j in range(K):
            h0, w0 = i * dilation, j * dilation
            taps.append(xpad[:, :, h0:h0 + (HO - 1) * stride + 1:stride,
                                   w0:w0 + (WO - 1) * stride + 1:stride])
    # tap-major channel ordering: index = (i*K + j)*Cin + c
    patch = jnp.concatenate(taps, axis=1).reshape(N, KKC, M)

    # ---- batch B images per grid step; zero-pad N up to a multiple of B
    #      (zero images contribute exactly 0 to the BN partial sums) ----
    B = max(1, min(N, batch_block))
    G = -(-N // B)
    N_pad = G * B
    if N_pad != N:
        patch = jnp.pad(patch, ((0, N_pad - N), (0, 0), (0, 0)))

    # ---- fused weight: weffT[o, (i*K+j)*Cin + c] = wp[o,c] * wd[c,i,j] ----
    wd_r = wd[:, 0, :, :].astype(jnp.float32)                 # (Cin, K, K)
    wp_r = wp[:, :, 0, 0].astype(jnp.float32)                 # (Cout, Cin)
    weffT = (wp_r[:, None, None, :] *
             jnp.transpose(wd_r, (1, 2, 0))[None, :, :, :]).reshape(Cout, KKC)

    cparams = pltpu.CompilerParams(
        dimension_semantics=("parallel",),     # no cross-step deps -> megacore OK
        vmem_limit_bytes=32 * 1024 * 1024,     # blocks are small; portable to v7x
    )

    # ---- kernel 1: conv + per-step partial BN stats ----
    y, psum, psumsq = pl.pallas_call(
        _conv_stats_kernel,
        grid=(G,),
        in_specs=[
            pl.BlockSpec((B, KKC, M), lambda g: (g, 0, 0)),
            pl.BlockSpec((Cout, KKC), lambda g: (0, 0)),
        ],
        out_specs=(
            pl.BlockSpec((B, Cout, M), lambda g: (g, 0, 0)),
            pl.BlockSpec((1, Cout, 1), lambda g: (g, 0, 0)),
            pl.BlockSpec((1, Cout, 1), lambda g: (g, 0, 0)),
        ),
        out_shape=(
            jax.ShapeDtypeStruct((N_pad, Cout, M), jnp.float32),
            jax.ShapeDtypeStruct((G, Cout, 1), jnp.float32),
            jax.ShapeDtypeStruct((G, Cout, 1), jnp.float32),
        ),
        compiler_params=cparams,
    )(patch, weffT)

    # ---- finalize BN batch stats (tiny XLA reduce over Cout-sized vectors) ----
    count = float(N * M)                        # true N: padded images are all-zero
    sum_c = jnp.sum(psum[:, :, 0], axis=0)
    sumsq_c = jnp.sum(psumsq[:, :, 0], axis=0)
    mean = sum_c / count
    var = sumsq_c / count - mean * mean         # biased variance (BatchNorm2d training)
    inv_std = lax.rsqrt(var + eps)
    gam = gamma.astype(jnp.float32)
    bet = beta.astype(jnp.float32)
    scale = (gam * inv_std).reshape(Cout, 1)
    shift = (bet - mean * gam * inv_std).reshape(Cout, 1)

    # ---- kernel 2: in-place normalize of the staged y (no conv recompute) ----
    out = pl.pallas_call(
        _bn_apply_kernel,
        grid=(G,),
        in_specs=[
            pl.BlockSpec((B, Cout, M), lambda g: (g, 0, 0)),
            pl.BlockSpec((Cout, 1), lambda g: (0, 0)),
            pl.BlockSpec((Cout, 1), lambda g: (0, 0)),
        ],
        out_specs=pl.BlockSpec((B, Cout, M), lambda g: (g, 0, 0)),
        out_shape=jax.ShapeDtypeStruct((N_pad, Cout, M), jnp.float32),
        input_output_aliases={0: 0},            # reuse y's HBM buffer for the output
        compiler_params=cparams,
    )(y, scale, shift)

    return out[:N].reshape(N, Cout, HO, WO)


def _reference(x, wd, wp, gamma, beta, *, stride, padding, dilation, eps=1e-5):
    xr = jnp.maximum(x, 0.0)
    dw = lax.conv_general_dilated(
        xr, wd, window_strides=(stride, stride),
        padding=[(padding, padding), (padding, padding)],
        rhs_dilation=(dilation, dilation),
        dimension_numbers=("NCHW", "OIHW", "NCHW"),
        feature_group_count=x.shape[1])
    pw = lax.conv_general_dilated(
        dw, wp, window_strides=(1, 1), padding="VALID",
        dimension_numbers=("NCHW", "OIHW", "NCHW"))
    mean = jnp.mean(pw, axis=(0, 2, 3), keepdims=True)
    var = jnp.mean((pw - mean) ** 2, axis=(0, 2, 3), keepdims=True)
    return ((pw - mean) * lax.rsqrt(var + eps)
            * gamma.reshape(1, -1, 1, 1) + beta.reshape(1, -1, 1, 1))


if __name__ == "__main__":
    # DilConv(channels_in=4, channels_out=8, kernel_size=3, stride=1,
    #         padding=2, dilation=2, affine=True)
    N, Cin, Cout, H, W = 2, 4, 8, 16, 16
    K, stride, padding, dilation = 3, 1, 2, 2

    key = jax.random.PRNGKey(0)
    kx, kd, kp, kg, kb = jax.random.split(key, 5)
    x = jax.random.normal(kx, (N, Cin, H, W), jnp.float32)
    wd = 0.1 * jax.random.normal(kd, (Cin, 1, K, K), jnp.float32)        # depthwise
    wp = 0.1 * jax.random.normal(kp, (Cout, Cin, 1, 1), jnp.float32)     # pointwise
    gamma = 1.0 + 0.1 * jax.random.normal(kg, (Cout,), jnp.float32)      # BN weight
    beta = 0.05 * jax.random.normal(kb, (Cout,), jnp.float32)            # BN bias

    fwd = jax.jit(functools.partial(dilconv_forward, stride=stride,
                                    padding=padding, dilation=dilation))
    out = jax.block_until_ready(fwd(x, wd, wp, gamma, beta))

    ref = jax.block_until_ready(
        _reference(x, wd, wp, gamma, beta,
                   stride=stride, padding=padding, dilation=dilation))

    assert out.shape == (N, Cout, H, W), out.shape
    assert jnp.allclose(out, ref, atol=2e-4, rtol=2e-4), float(jnp.max(jnp.abs(out - ref)))
    print("KERNEL_OK")
</pallas_src>

<mosaic_0001>
module attributes {stable_mosaic.version = 11 : i64} {
  func.func @_conv_stats_kernel(%arg0: i32, %arg1: memref<2x36x256xf32, #tpu.memory_space<vmem>>, %arg2: memref<8x36xf32, #tpu.memory_space<vmem>>, %arg3: memref<2x8x256xf32, #tpu.memory_space<vmem>>, %arg4: memref<1x8x1xf32, #tpu.memory_space<vmem>>, %arg5: memref<1x8x1xf32, #tpu.memory_space<vmem>>) attributes {dimension_semantics = [#tpu.dimension_semantics<parallel>], iteration_bounds = array<i64: 1>, scalar_prefetch = 0 : i64, scratch_operands = 0 : i64, tpu.core_type = #tpu.core_type<tc>, window_params = [{transform_indices = @transform_0, window_bounds = array<i64: 2, 36, 256>}, {pipeline_mode = #tpu.pipeline_mode<synchronous>, transform_indices = @transform_1, window_bounds = array<i64: 8, 36>}, {transform_indices = @transform_2, window_bounds = array<i64: 2, 8, 256>}, {transform_indices = @transform_3, window_bounds = array<i64: 1, 8, 1>}, {transform_indices = @transform_4, window_bounds = array<i64: 1, 8, 1>}]} {
    %c0 = arith.constant 0 : index
    %c0_0 = arith.constant 0 : index
    %0 = vector.load %arg2[%c0, %c0_0] : memref<8x36xf32, #tpu.memory_space<vmem>>, vector<8x36xf32>
    %cst = arith.constant 0.000000e+00 : f32
    %1 = vector.broadcast %cst : f32 to vector<8x1xf32>
    %cst_1 = arith.constant 0.000000e+00 : f32
    %2 = vector.broadcast %cst_1 : f32 to vector<8x1xf32>
    %c0_2 = arith.constant 0 : index
    %c0_3 = arith.constant 0 : index
    %c0_4 = arith.constant 0 : index
    %3 = vector.load %arg1[%c0_2, %c0_3, %c0_4] : memref<2x36x256xf32, #tpu.memory_space<vmem>>, vector<1x36x256xf32>
    %4 = vector.shape_cast %3 : vector<1x36x256xf32> to vector<36x256xf32>
    %cst_5 = arith.constant 0.000000e+00 : f32
    %5 = vector.broadcast %cst_5 : f32 to vector<36x256xf32>
    %6 = arith.maximumf %4, %5 : vector<36x256xf32>
    %cst_6 = arith.constant dense<0.000000e+00> : vector<8x256xf32>
    %7 = tpu.matmul %0, %6, %cst_6 {dimension_numbers = #tpu.dot_dimension_numbers<[1], [0], [0], [1], [0, 0, 1, 1], [], []>} : vector<8x36xf32>, vector<36x256xf32>, vector<8x256xf32> -> vector<8x256xf32>
    %c0_7 = arith.constant 0 : index
    %c0_8 = arith.constant 0 : index
    %c0_9 = arith.constant 0 : index
    %8 = vector.load %arg3[%c0_7, %c0_8, %c0_9] : memref<2x8x256xf32, #tpu.memory_space<vmem>>, vector<1x8x256xf32>
    %9 = vector.shape_cast %8 : vector<1x8x256xf32> to vector<8x256xf32>
    %10 = vector.shape_cast %7 : vector<8x256xf32> to vector<1x8x256xf32>
    tpu.vector_store %arg3[%c0_7, %c0_8, %c0_9], %10 {strides = array<i32>} : memref<2x8x256xf32, #tpu.memory_space<vmem>>, vector<1x8x256xf32>,
    %cst_10 = arith.constant dense<0.000000e+00> : vector<8xf32>
    %11 = vector.multi_reduction <add>, %7, %cst_10 [1] : vector<8x256xf32> to vector<8xf32>
    %12 = vector.shape_cast %11 : vector<8xf32> to vector<8x1xf32>
    %13 = arith.addf %1, %12 : vector<8x1xf32>
    %14 = arith.mulf %7, %7 : vector<8x256xf32>
    %cst_11 = arith.constant dense<0.000000e+00> : vector<8xf32>
    %15 = vector.multi_reduction <add>, %14, %cst_11 [1] : vector<8x256xf32> to vector<8xf32>
    %16 = vector.shape_cast %15 : vector<8xf32> to vector<8x1xf32>
    %17 = arith.addf %2, %16 : vector<8x1xf32>
    %c1 = arith.constant 1 : index
    %c0_12 = arith.constant 0 : index
    %c0_13 = arith.constant 0 : index
    %18 = vector.load %arg1[%c1, %c0_12, %c0_13] : memref<2x36x256xf32, #tpu.memory_space<vmem>>, vector<1x36x256xf32>
    %19 = vector.shape_cast %18 : vector<1x36x256xf32> to vector<36x256xf32>
    %cst_14 = arith.constant 0.000000e+00 : f32
    %20 = vector.broadcast %cst_14 : f32 to vector<36x256xf32>
    %21 = arith.maximumf %19, %20 : vector<36x256xf32>
    %cst_15 = arith.constant dense<0.000000e+00> : vector<8x256xf32>
    %22 = tpu.matmul %0, %21, %cst_15 {dimension_numbers = #tpu.dot_dimension_numbers<[1], [0], [0], [1], [0, 0, 1, 1], [], []>} : vector<8x36xf32>, vector<36x256xf32>, vector<8x256xf32> -> vector<8x256xf32>
    %c1_16 = arith.constant 1 : index
    %c0_17 = arith.constant 0 : index
    %c0_18 = arith.constant 0 : index
    %23 = vector.load %arg3[%c1_16, %c0_17, %c0_18] : memref<2x8x256xf32, #tpu.memory_space<vmem>>, vector<1x8x256xf32>
    %24 = vector.shape_cast %23 : vector<1x8x256xf32> to vector<8x256xf32>
    %25 = vector.shape_cast %22 : vector<8x256xf32> to vector<1x8x256xf32>
    tpu.vector_store %arg3[%c1_16, %c0_17, %c0_18], %25 {strides = array<i32>} : memref<2x8x256xf32, #tpu.memory_space<vmem>>, vector<1x8x256xf32>,
    %cst_19 = arith.constant dense<0.000000e+00> : vector<8xf32>
    %26 = vector.multi_reduction <add>, %22, %cst_19 [1] : vector<8x256xf32> to vector<8xf32>
    %27 = vector.shape_cast %26 : vector<8xf32> to vector<8x1xf32>
    %28 = arith.addf %13, %27 : vector<8x1xf32>
    %29 = arith.mulf %22, %22 : vector<8x256xf32>
    %cst_20 = arith.constant dense<0.000000e+00> : vector<8xf32>
    %30 = vector.multi_reduction <add>, %29, %cst_20 [1] : vector<8x256xf32> to vector<8xf32>
    %31 = vector.shape_cast %30 : vector<8xf32> to vector<8x1xf32>
    %32 = arith.addf %17, %31 : vector<8x1xf32>
    %c0_21 = arith.constant 0 : index
    %c0_22 = arith.constant 0 : index
    %c0_23 = arith.constant 0 : index
    %33 = vector.load %arg4[%c0_21, %c0_22, %c0_23] : memref<1x8x1xf32, #tpu.memory_space<vmem>>, vector<1x8x1xf32>
    %34 = vector.shape_cast %33 : vector<1x8x1xf32> to vector<8x1xf32>
    %35 = vector.shape_cast %28 : vector<8x1xf32> to vector<1x8x1xf32>
    tpu.vector_store %arg4[%c0_21, %c0_22, %c0_23], %35 {strides = array<i32>} : memref<1x8x1xf32, #tpu.memory_space<vmem>>, vector<1x8x1xf32>,
    %c0_24 = arith.constant 0 : index
    %c0_25 = arith.constant 0 : index
    %c0_26 = arith.constant 0 : index
    %36 = vector.load %arg5[%c0_24, %c0_25, %c0_26] : memref<1x8x1xf32, #tpu.memory_space<vmem>>, vector<1x8x1xf32>
    %37 = vector.shape_cast %36 : vector<1x8x1xf32> to vector<8x1xf32>
    %38 = vector.shape_cast %32 : vector<8x1xf32> to vector<1x8x1xf32>
    tpu.vector_store %arg5[%c0_24, %c0_25, %c0_26], %38 {strides = array<i32>} : memref<1x8x1xf32, #tpu.memory_space<vmem>>, vector<1x8x1xf32>,
    return
  }
  func.func @transform_0(%arg0: i32) -> (i32, i32, i32) {
    %c0_i32 = arith.constant 0 : i32
    %c0_i32_0 = arith.constant 0 : i32
    %c0_i32_1 = arith.constant 0 : i32
    return %arg0, %c0_i32, %c0_i32_0 : i32, i32, i32
  }
  func.func @transform_1(%arg0: i32) -> (i32, i32) {
    %c0_i32 = arith.constant 0 : i32
    %c0_i32_0 = arith.constant 0 : i32
    %c0_i32_1 = arith.constant 0 : i32
    return %c0_i32, %c0_i32_0 : i32, i32
  }
  func.func @transform_2(%arg0: i32) -> (i32, i32, i32) {
    %c0_i32 = arith.constant 0 : i32
    %c0_i32_0 = arith.constant 0 : i32
    %c0_i32_1 = arith.constant 0 : i32
    return %arg0, %c0_i32, %c0_i32_0 : i32, i32, i32
  }
  func.func @transform_3(%arg0: i32) -> (i32, i32, i32) {
    %c0_i32 = arith.constant 0 : i32
    %c0_i32_0 = arith.constant 0 : i32
    %c0_i32_1 = arith.constant 0 : i32
    return %arg0, %c0_i32, %c0_i32_0 : i32, i32, i32
  }
  func.func @transform_4(%arg0: i32) -> (i32, i32, i32) {
    %c0_i32 = arith.constant 0 : i32
    %c0_i32_0 = arith.constant 0 : i32
    %c0_i32_1 = arith.constant 0 : i32
    return %arg0, %c0_i32, %c0_i32_0 : i32, i32, i32
  }
}

module attributes {stable_mosaic.version = 11 : i64} {
  func.func @_bn_apply_kernel(%arg0: i32, %arg1: memref<2x8x256xf32, #tpu.memory_space<vmem>>, %arg2: memref<8x1xf32, #tpu.memory_space<vmem>>, %arg3: memref<8x1xf32, #tpu.memory_space<vmem>>, %arg4: memref<2x8x256xf32, #tpu.memory_space<vmem>>) attributes {dimension_semantics = [#tpu.dimension_semantics<parallel>], iteration_bounds = array<i64: 1>, scalar_prefetch = 0 : i64, scratch_operands = 0 : i64, tpu.core_type = #tpu.core_type<tc>, window_params = [{transform_indices = @transform_0, window_bounds = array<i64: 2, 8, 256>}, {pipeline_mode = #tpu.pipeline_mode<synchronous>, transform_indices = @transform_1, window_bounds = array<i64: 8, 1>}, {pipeline_mode = #tpu.pipeline_mode<synchronous>, transform_indices = @transform_2, window_bounds = array<i64: 8, 1>}, {transform_indices = @transform_3, window_bounds = array<i64: 2, 8, 256>}]} {
    %c0 = arith.constant 0 : index
    %c0_0 = arith.constant 0 : index
    %c0_1 = arith.constant 0 : index
    %0 = vector.load %arg1[%c0, %c0_0, %c0_1] : memref<2x8x256xf32, #tpu.memory_space<vmem>>, vector<2x8x256xf32>
    %c0_2 = arith.constant 0 : index
    %c0_3 = arith.constant 0 : index
    %1 = vector.load %arg2[%c0_2, %c0_3] : memref<8x1xf32, #tpu.memory_space<vmem>>, vector<8x1xf32>
    %2 = vector.shape_cast %1 : vector<8x1xf32> to vector<1x8x1xf32>
    %3 = vector.broadcast %2 : vector<1x8x1xf32> to vector<2x8x256xf32>
    %4 = arith.mulf %0, %3 : vector<2x8x256xf32>
    %c0_4 = arith.constant 0 : index
    %c0_5 = arith.constant 0 : index
    %5 = vector.load %arg3[%c0_4, %c0_5] : memref<8x1xf32, #tpu.memory_space<vmem>>, vector<8x1xf32>
    %6 = vector.shape_cast %5 : vector<8x1xf32> to vector<1x8x1xf32>
    %7 = vector.broadcast %6 : vector<1x8x1xf32> to vector<2x8x256xf32>
    %8 = arith.addf %4, %7 : vector<2x8x256xf32>
    %c0_6 = arith.constant 0 : index
    %c0_7 = arith.constant 0 : index
    %c0_8 = arith.constant 0 : index
    %9 = vector.load %arg4[%c0_6, %c0_7, %c0_8] : memref<2x8x256xf32, #tpu.memory_space<vmem>>, vector<2x8x256xf32>
    tpu.vector_store %arg4[%c0_6, %c0_7, %c0_8], %8 {strides = array<i32>} : memref<2x8x256xf32, #tpu.memory_space<vmem>>, vector<2x8x256xf32>,
    return
  }
  func.func @transform_0(%arg0: i32) -> (i32, i32, i32) {
    %c0_i32 = arith.constant 0 : i32
    %c0_i32_0 = arith.constant 0 : i32
    %c0_i32_1 = arith.constant 0 : i32
    return %arg0, %c0_i32, %c0_i32_0 : i32, i32, i32
  }
  func.func @transform_1(%arg0: i32) -> (i32, i32) {
    %c0_i32 = arith.constant 0 : i32
    %c0_i32_0 = arith.constant 0 : i32
    %c0_i32_1 = arith.constant 0 : i32
    return %c0_i32, %c0_i32_0 : i32, i32
  }
  func.func @transform_2(%arg0: i32) -> (i32, i32) {
    %c0_i32 = arith.constant 0 : i32
    %c0_i32_0 = arith.constant 0 : i32
    %c0_i32_1 = arith.constant 0 : i32
    return %c0_i32, %c0_i32_0 : i32, i32
  }
  func.func @transform_3(%arg0: i32) -> (i32, i32, i32) {
    %c0_i32 = arith.constant 0 : i32
    %c0_i32_0 = arith.constant 0 : i32
    %c0_i32_1 = arith.constant 0 : i32
    return %arg0, %c0_i32, %c0_i32_0 : i32, i32, i32
  }
}

</mosaic_0001>

<bundles_post_ra>
// kernel: dilconv_forward.3
= control target key start
LH: loop header
LB: loop body
LE: loop exit
PB: predicated region body
PF: predicated region fallthrough
CT: control target
= control target key end

     0   :  { %v48_v0 = vmov 0   ;;  %s99_s1 = inlined_call_operand.vmem [shape: f32[8,1], index: 1, kind: input, shape index: {}]   ;;  %s100_s2 = inlined_call_operand.vmem [shape: f32[8,1], index: 2, kind: input, shape index: {}]   ;;  %s101_s0 = inlined_call_operand.vmem [shape: f32[2,8,256], index: 0, kind: input, shape index: {}, may-alias: {0,3}]   ;;  %s102_s3 = inlined_call_operand.vmem [shape: f32[2,8,256], index: 3, kind: output, shape index: {}, may-alias: {0,3}]  }
   0x1   :  { %47 = vset.pattern.permute.xlu0 %v48_v0  ;;  %v18_v1 = vld [vmem:[%s99_s1] sm:$0xff]  ;;  %v15_v5 = vld [vmem:[%s101_s0 + $0x8] sm:$0xff]  ;;  %v16_v6 = vld [vmem:[%s101_s0 + $0x10] sm:$0xff] }
   0x2   :  { %21 = vperm.xlu0 %47, %v18_v1   ;;  %v28_v2 = vld [vmem:[%s100_s2] sm:$0xff]  ;;  %v17_v7 = vld [vmem:[%s101_s0 + $0x18] sm:$0xff] }
   0x3   :  { %v14_v3 = vld [vmem:[%s101_s0] sm:$0xff] }
   0x6   :  { %31 = vperm.xlu0 %47, %v28_v2  }
  0x81   :  { %v22_v4 = vpop.permute.xlu0 %21 }
  0x82   :  { %v24_v8 = vmul.f32 %v22_v4, %v14_v3  ;;  %v25_v9 = vmul.f32 %v22_v4, %v15_v5  ;;  %v26_v10 = vmul.f32 %v22_v4, %v16_v6  ;;  %v27_v11 = vmul.f32 %v22_v4, %v17_v7 }
  0x85   :  { %v32_v12 = vpop.permute.xlu0 %31 }
  0x86   :  { %v34_v13 = vadd.f32 %v32_v12, %v24_v8  ;;  %v35_v14 = vadd.f32 %v32_v12, %v25_v9  ;;  %v36_v15 = vadd.f32 %v32_v12, %v26_v10  ;;  %v37_v16 = vadd.f32 %v32_v12, %v27_v11 }
  0x88   :  { %38 = vst [vmem:[%s102_s3] sm:$0xff] %v34_v13  ;;  %39 = vst [vmem:[%s102_s3 + $0x8] sm:$0xff] %v35_v14 }
  0x89   :  { %40 = vst [vmem:[%s102_s3 + $0x10] sm:$0xff] %v36_v15  ;;  %41 = vst [vmem:[%s102_s3 + $0x18] sm:$0xff] %v37_v16 }

// kernel: dilconv_forward.2
= control target key start
LH: loop header
LB: loop body
LE: loop exit
PB: predicated region body
PF: predicated region fallthrough
CT: control target
= control target key end

     0   :  { %v290_v3 = vmov 0.0   ;;  %vm39_vm0 = vcmask 1043456   ;;  %vm35_vm1 = vcmask 293888   ;;  %vm240_vm2 = vcmask 7168   ;;  %s397_s0 = inlined_call_operand.vmem [shape: f32[2,36,256], index: 0, kind: input, shape index: {}]   ;;  %s398_s1 = inlined_call_operand.vmem [shape: f32[8,36], index: 1, kind: input, shape index: {}]   ;;  %s399_s2 = inlined_call_operand.vmem [shape: f32[2,8,256], index: 2, kind: output, shape index: {0}]   ;;  %s400_s3 = inlined_call_operand.vmem [shape: f32[1,8,1], index: 3, kind: output, shape index: {1}]   ;;  %s401_s4 = inlined_call_operand.vmem [shape: f32[1,8,1], index: 4, kind: output, shape index: {2}]  }
   0x1   :  { %v16_v0 = vld [vmem:[%s397_s0 + $0x8] sm:$0xff]  ;;  %v18_v1 = vld [vmem:[%s397_s0 + $0x18] sm:$0xff]  ;;  %110 = vmatprep.mubr.f32.mxu0 %v290_v3  ;;  %220 = vmatprep.mubr.f32.mxu1 %v290_v3  ;;  %v15_v8 = vld [vmem:[%s397_s0] sm:$0xff] }
   0x2   :  { %v259_v2 = vld [vmem:[%s397_s0 + $0x58] sm:$0xff]  ;;  %v26_v4 = vmax.f32 %v16_v0, 0.0  ;;  %v28_v5 = vmax.f32 %v18_v1, 0.0  ;;  %v261_v6 = vld [vmem:[%s397_s0 + $0x68] sm:$0xff]  ;;  %v17_v9 = vld [vmem:[%s397_s0 + $0x10] sm:$0xff]  ;;  %v25_v11 = vmax.f32 %v15_v8, 0.0 }
   0x3   :  { %v141_v7 = vmax.f32 %v259_v2, 0.0  ;;  %v143_v10 = vmax.f32 %v261_v6, 0.0  ;;  %v27_v12 = vmax.f32 %v17_v9, 0.0  ;;  %v258_v13 = vld [vmem:[%s397_s0 + $0x50] sm:$0xff]  ;;  %v260_v14 = vld [vmem:[%s397_s0 + $0x60] sm:$0xff]  ;;  %v20_v15 = vld [vmem:[%s397_s0 + $0x28] sm:$0xff] }
   0x4   :  { %v273_v16 = vpack.c.bf16 %v28_v5, %v26_v4  ;;  %v140_v17 = vmax.f32 %v258_v13, 0.0  ;;  %v142_v18 = vmax.f32 %v260_v14, 0.0  ;;  %v22_v19 = vld [vmem:[%s397_s0 + $0x38] sm:$0xff]  ;;  %v30_v20 = vmax.f32 %v20_v15, 0.0  ;;  %v265_v22 = vld [vmem:[%s397_s0 + $0x88] sm:$0xff]  ;;  %v19_v27 = vld [vmem:[%s397_s0 + $0x20] sm:$0xff] }
   0x5   :  { %v263_v21 = vld [vmem:[%s397_s0 + $0x78] sm:$0xff]  ;;  %v281_v23 = vpack.c.bf16 %v143_v10, %v141_v7  ;;  %v275_v24 = vpack.c.bf16 %v27_v12, %v25_v11  ;;  %v32_v25 = vmax.f32 %v22_v19, 0.0  ;;  %v21_v28 = vld [vmem:[%s397_s0 + $0x30] sm:$0xff]  ;;  %v147_v31 = vmax.f32 %v265_v22, 0.0  ;;  %v264_v34 = vld [vmem:[%s397_s0 + $0x80] sm:$0xff] }
   0x6   :  { %v145_v26 = vmax.f32 %v263_v21, 0.0  ;;  %v262_v29 = vld [vmem:[%s397_s0 + $0x70] sm:$0xff]  ;;  %274 = vmatprep.subr.bf16.mxu0 %v273_v16  ;;  %v283_v30 = vpack.c.bf16 %v142_v18, %v140_v17  ;;  %v29_v32 = vmax.f32 %v19_v27, 0.0  ;;  %v31_v33 = vmax.f32 %v21_v28, 0.0  ;;  %v24_v35 = vld [vmem:[%s397_s0 + $0x48] sm:$0xf] }
   0x7   :  { %282 = vmatprep.subr.bf16.mxu1 %v281_v23  ;;  %276 = vmatpush1.bf16.msra.mxu0 %v275_v24  ;;  %v277_v36 = vpack.c.bf16 %v32_v25, %v30_v20  ;;  %v144_v37 = vmax.f32 %v262_v29, 0.0  ;;  %v146_v38 = vmax.f32 %v264_v34, 0.0  ;;  %v267_v39 = vld [vmem:[%s397_s0 + $0x98] sm:$0xf]  ;;  %v34_v42 = vmax.f32 %v24_v35, 0.0  ;;  %v14_v49 = vld [vmem:[%s398_s1] sm:$0xff] }
   0x8   :  { %284 = vmatpush1.bf16.msra.mxu1 %v283_v30  ;;  %v285_v40 = vpack.c.bf16 %v147_v31, %v145_v26  ;;  %v279_v41 = vpack.c.bf16 %v31_v33, %v29_v32  ;;  %v23_v43 = vld [vmem:[%s397_s0 + $0x40] sm:$0xf]  ;;  %v149_v45 = vmax.f32 %v267_v39, 0.0  ;;  %v266_v46 = vld [vmem:[%s397_s0 + $0x90] sm:$0xf] }
   0x9   :  { %278 = vmatprep.subr.bf16.mxu0 %v277_v36  ;;  %v287_v44 = vpack.c.bf16 %v146_v38, %v144_v37  ;;  %v33_v47 = vmax.f32 %v23_v43, 0.0  ;;  %v148_v48 = vmax.f32 %v266_v46, 0.0 }
   0xa   :  { %286 = vmatprep.subr.bf16.mxu1 %v285_v40 }
   0xb   :  { %280 = vmatpush1.bf16.msra.mxu0 %v279_v41 }
   0xc   :  { %288 = vmatpush1.bf16.msra.mxu1 %v287_v44  ;;  %255 = vmatprep.subr.msk.mxu0 %vm39_vm0, %v34_v42 }
   0xd   :  { %268 = vmatprep.subr.msk.mxu1 %vm39_vm0, %v149_v45 }
   0xf   :  { %256 = vmatpush1.msk.msra.mxu0 %vm39_vm0, %v33_v47 }
  0x10   :  { %269 = vmatpush1.msk.msra.mxu1 %vm39_vm0, %v148_v48  ;;  %257 = vmatmul.mubr.msk.f32.vlgmr.msra.gmra.mrb[0].mxu0 %vm35_vm1, %v14_v49 }
  0x11   :  { %270 = vmatmul.mubr.msk.f32.vlgmr.msra.gmra.mrb[0].mxu1 %vm35_vm1, %v14_v49 }
  0xe3   :  { %v112_v50 = vpop.f32.mrb[0].mxu0 }
  0xe4   :  { %117 = vst [vmem:[%s399_s2] sm:$0xff] %v112_v50  ;;  %v222_v51 = vpop.f32.mrb[0].mxu1  ;;  %v114_v52 = vpop.f32.mrb[1].mxu0  ;;  %v123_v53 = vmul.f32 %v112_v50, %v112_v50 }
  0xe5   :  { %271 = vst [vmem:[%s399_s2 + $0x10] sm:$0xff] %v222_v51  ;;  %118 = vst [vmem:[%s399_s2 + $0x8] sm:$0xff] %v114_v52  ;;  %v124_v54 = vmul.f32 %v114_v52, %v114_v52  ;;  %v224_v55 = vpop.f32.mrb[1].mxu1  ;;  %v119_v56 = vadd.f32 %v114_v52, %v112_v50  ;;  %v234_v57 = vmul.f32 %v222_v51, %v222_v51 }
  0xe6   :  { %272 = vst [vmem:[%s399_s2 + $0x18] sm:$0xff] %v224_v55  ;;  %v235_v58 = vmul.f32 %v224_v55, %v224_v55  ;;  %v230_v59 = vadd.f32 %v224_v55, %v222_v51 }
  0xe7   :  { %120 = vadd.xlane.f32.xlu0 %v119_v56  ;;  %v125_v60 = vadd.f32 %v124_v54, %v123_v53 }
  0xe8   :  { %231 = vadd.xlane.f32.xlu1 %v230_v59  ;;  %v236_v61 = vadd.f32 %v235_v58, %v234_v57 }
  0xeb   :  { %126 = vadd.xlane.f32.xlu0 %v125_v60 }
  0xec   :  { %237 = vadd.xlane.f32.xlu1 %v236_v61 }
 0x174   :  { %v121_v62 = vpop.xlane.xlu0 %120 }
 0x175   :  { %v232_v63 = vpop.xlane.xlu1 %231 }
 0x176   :  { %v233_v0 = vadd.f32 %v232_v63, %v121_v62 }
 0x178   :  { %241 = vst.msk [vmem:[%s400_s3] sm:$0xff] %vm240_vm2, %v233_v0  ;;  %v127_v1 = vpop.xlane.xlu0 %126 }
 0x179   :  { %v238_v2 = vpop.xlane.xlu1 %237 }
 0x17a   :  { %v239_v3 = vadd.f32 %v238_v2, %v127_v1 }
 0x17c   :  { %242 = vst.msk [vmem:[%s401_s4] sm:$0xff] %vm240_vm2, %v239_v3 }

</bundles_post_ra>
